<compile_context>
chip_gen: v6e
topology: v6e:2x2x1
jax: 0.10.0
libtpu: 0.0.40
codegen_flags: <defaults>
</compile_context>

<pallas_src>
import functools

import jax
import jax.numpy as jnp
from jax.experimental import pallas as pl
from jax.experimental.pallas import tpu as pltpu


def _round_up(x: int, m: int) -> int:
    return (x + m - 1) // m * m


def _pad_to(a, shape):
    return jnp.pad(a, [(0, s - d) for d, s in zip(a.shape, shape)])


# ---------------------------------------------------------------------------
# Fast path: no grid, whole problem in VMEM, depth loop unrolled in-kernel.
# ---------------------------------------------------------------------------
def _rhn_fused_kernel(x_ref, hprev_ref, wx_ref, bx_ref, w_ref, b_ref, out_ref,
                      *, depth):
    Hp = out_ref.shape[1]
    # Input transform (bf16 operands, f32 accumulation).
    h = jnp.dot(x_ref[...], wx_ref[...],
                preferred_element_type=jnp.float32) + bx_ref[...]
    # Highway layers, statically unrolled (depth is small whenever this path
    # is selected); each layer is one fused (Bp,Hp)@(Hp,2Hp) GEMM.
    for i in range(depth):
        z = jnp.dot(h.astype(jnp.bfloat16), w_ref[i],
                    preferred_element_type=jnp.float32) + b_ref[i]
        t_gate = jax.nn.sigmoid(z[:, :Hp])
        h_layer = jnp.tanh(z[:, Hp:])
        h = h + t_gate * (h_layer - h)       # == t*hl + (1-t)*h
    out_ref[...] = (h + hprev_ref[...]).astype(out_ref.dtype)


# ---------------------------------------------------------------------------
# Streaming path: one highway layer per grid step; h carried in out_ref.
# ---------------------------------------------------------------------------
def _rhn_stream_kernel(x_ref, hprev_ref, wx_ref, bx_ref, w_ref, b_ref, out_ref):
    i = pl.program_id(0)
    last = pl.num_programs(0) - 1
    Hp = out_ref.shape[1]

    # Input transform on the first grid step only; out_ref (constant block
    # index) doubles as the resident f32 hidden-state accumulator.
    @pl.when(i == 0)
    def _init():
        out_ref[...] = jnp.dot(x_ref[...], wx_ref[...],
                               preferred_element_type=jnp.float32) + bx_ref[...]

    h = out_ref[...]                                          # (Bp, Hp) f32

    # Fused gate+candidate GEMM: (Bp,Hp)@(Hp,2Hp), bf16 operands, f32 accum.
    z = jnp.dot(h.astype(jnp.bfloat16), w_ref[...],
                preferred_element_type=jnp.float32) + b_ref[...]
    t_gate = jax.nn.sigmoid(z[:, :Hp])
    h_layer = jnp.tanh(z[:, Hp:])
    h_new = h + t_gate * (h_layer - h)

    @pl.when(i != last)
    def _store():
        out_ref[...] = h_new

    @pl.when(i == last)
    def _store_final():
        out_ref[...] = h_new + hprev_ref[...]


# ---------------------------------------------------------------------------
# Wrapper
# ---------------------------------------------------------------------------
_FAST_PATH_VMEM_BUDGET = 24 * 1024 * 1024   # ~half of the smallest scoped VMEM target


def _vmem_limit(needed_bytes: int) -> int:
    return int(min(128 * 1024 * 1024,
                   max(32 * 1024 * 1024, needed_bytes * 3 // 2 + (2 << 20))))


def rhn_cell_forward(x_t, h_prev, params, *, depth, force_stream=False):
    """One RHN cell step. params hold f32 weights; packing/padding/casting here."""
    B, I = x_t.shape
    H = h_prev.shape[1]

    Bp = _round_up(B, 8)
    Ip = _round_up(I, 128)
    Hp = _round_up(H, 128)

    # --- pack / pad / cast (done once, offline, in a real deployment) ---
    x_p = _pad_to(x_t, (Bp, Ip)).astype(jnp.bfloat16)
    h_prev_p = _pad_to(h_prev.astype(jnp.float32), (Bp, Hp))

    wx = _pad_to(params["wx"], (Ip, Hp)).astype(jnp.bfloat16)
    bx = _pad_to(params["bx"], (1, Hp)).astype(jnp.float32)

    # Fused per-layer weights: cols [0:Hp) = transform gate, [Hp:2Hp) = candidate.
    wt = _pad_to(params["wt"], (depth, Hp, Hp))
    wl = _pad_to(params["wl"], (depth, Hp, Hp))
    w_hw = jnp.concatenate([wt, wl], axis=2).astype(jnp.bfloat16)    # (depth, Hp, 2Hp)
    bt = _pad_to(params["bt"], (depth, 1, Hp))
    bl = _pad_to(params["bl"], (depth, 1, Hp))
    b_hw = jnp.concatenate([bt, bl], axis=2).astype(jnp.float32)     # (depth, 1, 2Hp)

    # --- advisory cost estimate (every operand streamed exactly once) ---
    flops = 2 * Bp * Ip * Hp + depth * 2 * Bp * Hp * (2 * Hp)
    transcendentals = 2 * Bp * Hp * depth
    bytes_accessed = (x_p.size * 2 + wx.size * 2 + bx.size * 4
                      + w_hw.size * 2 + b_hw.size * 4
                      + h_prev_p.size * 4 + Bp * Hp * 4)
    cost = pl.CostEstimate(flops=flops, transcendentals=transcendentals,
                           bytes_accessed=bytes_accessed)

    # --- VMEM working-set estimates ---
    resident = (x_p.size * 2 + h_prev_p.size * 4 + wx.size * 2 + bx.size * 4
                + Bp * Hp * 4)                         # + out_ref / carried h
    work = Bp * 2 * Hp * 4 + 2 * Bp * Hp * 4            # z + gate temporaries
    layer_w = Hp * 2 * Hp * 2 + 2 * Hp * 4               # one layer's fused W + b (bf16/f32)

    fast_bytes = resident + work + depth * layer_w
    use_fast = ((not force_stream)
                and fast_bytes <= _FAST_PATH_VMEM_BUDGET
                and depth <= 32)

    if use_fast:
        out_p = pl.pallas_call(
            functools.partial(_rhn_fused_kernel, depth=depth),
            out_shape=jax.ShapeDtypeStruct((Bp, Hp), jnp.float32),
            compiler_params=pltpu.CompilerParams(
                vmem_limit_bytes=_vmem_limit(fast_bytes)),
            cost_estimate=cost,
        )(x_p, h_prev_p, wx, bx, w_hw, b_hw)
    else:
        # Streaming path: depth as pipelined grid axis.  Double-buffer only the
        # per-layer weight stream; single-buffer the constant-index operands.
        stream_bytes = resident + work + 2 * layer_w
        out_p = pl.pallas_call(
            _rhn_stream_kernel,
            out_shape=jax.ShapeDtypeStruct((Bp, Hp), jnp.float32),
            grid_spec=pltpu.PrefetchScalarGridSpec(
                num_scalar_prefetch=0,
                grid=(depth,),
                in_specs=[
                    pl.BlockSpec((Bp, Ip), lambda i: (0, 0),
                                 pipeline_mode=pl.Buffered(1)),       # x (bf16)
                    pl.BlockSpec((Bp, Hp), lambda i: (0, 0),
                                 pipeline_mode=pl.Buffered(1)),       # h_prev (f32)
                    pl.BlockSpec((Ip, Hp), lambda i: (0, 0),
                                 pipeline_mode=pl.Buffered(1)),       # Wx (bf16)
                    pl.BlockSpec((1, Hp), lambda i: (0, 0),
                                 pipeline_mode=pl.Buffered(1)),       # bx (f32)
                    # Per-layer fused weights/bias; leading depth dim squeezed,
                    # default double-buffering prefetches layer i+1 during layer i.
                    pl.BlockSpec((pl.Squeezed(), Hp, 2 * Hp), lambda i: (i, 0, 0)),
                    pl.BlockSpec((pl.Squeezed(), 1, 2 * Hp), lambda i: (i, 0, 0)),
                ],
                out_specs=pl.BlockSpec((Bp, Hp), lambda i: (0, 0)),
            ),
            compiler_params=pltpu.CompilerParams(
                dimension_semantics=("arbitrary",),
                vmem_limit_bytes=_vmem_limit(stream_bytes)),
            cost_estimate=cost,
        )(x_p, h_prev_p, wx, bx, w_hw, b_hw)

    return out_p[:B, :H]


# ---------------------------------------------------------------------------
# Params / reference
# ---------------------------------------------------------------------------
def init_params(key, input_size, hidden_size, depth):
    """Deterministic init mirroring nn.Linear default U[-1/sqrt(fan_in), 1/sqrt(fan_in)].

    Weights stored transposed: (in_features, out_features); biases (1, H) /
    (depth, 1, H).  Kept f32; the wrapper casts the matmul operands to bf16.
    """
    ks = jax.random.split(key, 6)
    s_in = 1.0 / jnp.sqrt(jnp.float32(input_size))
    s_h = 1.0 / jnp.sqrt(jnp.float32(hidden_size))
    u = lambda k, shape, s: jax.random.uniform(k, shape, jnp.float32, -s, s)
    return {
        "wx": u(ks[0], (input_size, hidden_size), s_in),
        "bx": u(ks[1], (1, hidden_size), s_in),
        "wl": u(ks[2], (depth, hidden_size, hidden_size), s_h),
        "bl": u(ks[3], (depth, 1, hidden_size), s_h),
        "wt": u(ks[4], (depth, hidden_size, hidden_size), s_h),
        "bt": u(ks[5], (depth, 1, hidden_size), s_h),
    }


def rhn_cell_reference(x_t, h_prev, params, *, depth):
    """Pure-JAX f32 reference (matches the PyTorch module)."""
    h = x_t @ params["wx"] + params["bx"]
    for i in range(depth):
        t = jax.nn.sigmoid(h @ params["wt"][i] + params["bt"][i])
        hl = jnp.tanh(h @ params["wl"][i] + params["bl"][i])
        h = t * hl + (1.0 - t) * h
    return h + h_prev


if __name__ == "__main__":
    input_size, hidden_size, depth = 16, 32, 2
    batch = 8

    key = jax.random.PRNGKey(0)
    k_x, k_h, k_p = jax.random.split(key, 3)

    x_t = jax.random.normal(k_x, (batch, input_size), jnp.float32)
    h_prev = jax.random.normal(k_h, (batch, hidden_size), jnp.float32)
    params = init_params(k_p, input_size, hidden_size, depth)

    ref = rhn_cell_reference(x_t, h_prev, params, depth=depth)

    # Fast path (selected automatically at these shapes).
    out_fast = jax.block_until_ready(
        rhn_cell_forward(x_t, h_prev, params, depth=depth))
    assert out_fast.shape == (batch, hidden_size)
    err_fast = float(jnp.max(jnp.abs(out_fast - ref)))
    assert jnp.allclose(out_fast, ref, atol=2e-2, rtol=2e-2), \
        f"fast path max abs err {err_fast}"

    # Streaming path (forced, to exercise the large-model code path too).
    out_stream = jax.block_until_ready(
        rhn_cell_forward(x_t, h_prev, params, depth=depth, force_stream=True))
    err_stream = float(jnp.max(jnp.abs(out_stream - ref)))
    assert jnp.allclose(out_stream, ref, atol=2e-2, rtol=2e-2), \
        f"streaming path max abs err {err_stream}"

    print("KERNEL_OK")
</pallas_src>

<mosaic_0001>
module attributes {stable_mosaic.version = 11 : i64} {
  func.func @_rhn_fused_kernel(%arg0: memref<8x128xbf16, #tpu.memory_space<vmem>>, %arg1: memref<8x128xf32, #tpu.memory_space<vmem>>, %arg2: memref<128x128xbf16, #tpu.memory_space<vmem>>, %arg3: memref<1x128xf32, #tpu.memory_space<vmem>>, %arg4: memref<2x128x256xbf16, #tpu.memory_space<vmem>>, %arg5: memref<2x1x256xf32, #tpu.memory_space<vmem>>, %arg6: memref<8x128xf32, #tpu.memory_space<vmem>>) attributes {dimension_semantics = [], scalar_prefetch = 0 : i64, scratch_operands = 0 : i64, tpu.core_type = #tpu.core_type<tc>} {
    %c0 = arith.constant 0 : index
    %c0_0 = arith.constant 0 : index
    %0 = vector.load %arg0[%c0, %c0_0] : memref<8x128xbf16, #tpu.memory_space<vmem>>, vector<8x128xbf16>
    %c0_1 = arith.constant 0 : index
    %c0_2 = arith.constant 0 : index
    %1 = vector.load %arg2[%c0_1, %c0_2] : memref<128x128xbf16, #tpu.memory_space<vmem>>, vector<128x128xbf16>
    %cst = arith.constant dense<0.000000e+00> : vector<8x128xf32>
    %2 = tpu.matmul %0, %1, %cst {dimension_numbers = #tpu.dot_dimension_numbers<[1], [0], [0], [1], [0, 0, 1, 1], [], []>} : vector<8x128xbf16>, vector<128x128xbf16>, vector<8x128xf32> -> vector<8x128xf32>
    %c0_3 = arith.constant 0 : index
    %c0_4 = arith.constant 0 : index
    %3 = vector.load %arg3[%c0_3, %c0_4] : memref<1x128xf32, #tpu.memory_space<vmem>>, vector<1x128xf32>
    %4 = vector.broadcast %3 : vector<1x128xf32> to vector<8x128xf32>
    %5 = arith.addf %2, %4 : vector<8x128xf32>
    %6 = arith.truncf %5 : vector<8x128xf32> to vector<8x128xbf16>
    %c0_5 = arith.constant 0 : index
    %c0_6 = arith.constant 0 : index
    %c0_7 = arith.constant 0 : index
    %7 = vector.load %arg4[%c0_5, %c0_6, %c0_7] : memref<2x128x256xbf16, #tpu.memory_space<vmem>>, vector<1x128x256xbf16>
    %8 = vector.shape_cast %7 : vector<1x128x256xbf16> to vector<128x256xbf16>
    %cst_8 = arith.constant dense<0.000000e+00> : vector<8x256xf32>
    %9 = tpu.matmul %6, %8, %cst_8 {dimension_numbers = #tpu.dot_dimension_numbers<[1], [0], [0], [1], [0, 0, 1, 1], [], []>} : vector<8x128xbf16>, vector<128x256xbf16>, vector<8x256xf32> -> vector<8x256xf32>
    %c0_9 = arith.constant 0 : index
    %c0_10 = arith.constant 0 : index
    %c0_11 = arith.constant 0 : index
    %10 = vector.load %arg5[%c0_9, %c0_10, %c0_11] : memref<2x1x256xf32, #tpu.memory_space<vmem>>, vector<1x1x256xf32>
    %11 = vector.shape_cast %10 : vector<1x1x256xf32> to vector<1x256xf32>
    %12 = vector.broadcast %11 : vector<1x256xf32> to vector<8x256xf32>
    %13 = arith.addf %9, %12 : vector<8x256xf32>
    %14 = vector.extract_strided_slice %13 {offsets = [0, 0], sizes = [8, 128], strides = [1, 1]} : vector<8x256xf32> to vector<8x128xf32>
    %15 = arith.negf %14 : vector<8x128xf32>
    %16 = math.exp %15 : vector<8x128xf32>
    %cst_12 = arith.constant 1.000000e+00 : f32
    %17 = vector.broadcast %cst_12 : f32 to vector<8x128xf32>
    %18 = arith.addf %17, %16 : vector<8x128xf32>
    %19 = arith.divf %17, %18 : vector<8x128xf32>
    %20 = vector.extract_strided_slice %13 {offsets = [0, 128], sizes = [8, 128], strides = [1, 1]} : vector<8x256xf32> to vector<8x128xf32>
    %21 = math.tanh %20 : vector<8x128xf32>
    %22 = arith.subf %21, %5 : vector<8x128xf32>
    %23 = arith.mulf %19, %22 : vector<8x128xf32>
    %24 = arith.addf %5, %23 : vector<8x128xf32>
    %25 = arith.truncf %24 : vector<8x128xf32> to vector<8x128xbf16>
    %c1 = arith.constant 1 : index
    %c0_13 = arith.constant 0 : index
    %c0_14 = arith.constant 0 : index
    %26 = vector.load %arg4[%c1, %c0_13, %c0_14] : memref<2x128x256xbf16, #tpu.memory_space<vmem>>, vector<1x128x256xbf16>
    %27 = vector.shape_cast %26 : vector<1x128x256xbf16> to vector<128x256xbf16>
    %cst_15 = arith.constant dense<0.000000e+00> : vector<8x256xf32>
    %28 = tpu.matmul %25, %27, %cst_15 {dimension_numbers = #tpu.dot_dimension_numbers<[1], [0], [0], [1], [0, 0, 1, 1], [], []>} : vector<8x128xbf16>, vector<128x256xbf16>, vector<8x256xf32> -> vector<8x256xf32>
    %c1_16 = arith.constant 1 : index
    %c0_17 = arith.constant 0 : index
    %c0_18 = arith.constant 0 : index
    %29 = vector.load %arg5[%c1_16, %c0_17, %c0_18] : memref<2x1x256xf32, #tpu.memory_space<vmem>>, vector<1x1x256xf32>
    %30 = vector.shape_cast %29 : vector<1x1x256xf32> to vector<1x256xf32>
    %31 = vector.broadcast %30 : vector<1x256xf32> to vector<8x256xf32>
    %32 = arith.addf %28, %31 : vector<8x256xf32>
    %33 = vector.extract_strided_slice %32 {offsets = [0, 0], sizes = [8, 128], strides = [1, 1]} : vector<8x256xf32> to vector<8x128xf32>
    %34 = arith.negf %33 : vector<8x128xf32>
    %35 = math.exp %34 : vector<8x128xf32>
    %cst_19 = arith.constant 1.000000e+00 : f32
    %36 = vector.broadcast %cst_19 : f32 to vector<8x128xf32>
    %37 = arith.addf %36, %35 : vector<8x128xf32>
    %38 = arith.divf %36, %37 : vector<8x128xf32>
    %39 = vector.extract_strided_slice %32 {offsets = [0, 128], sizes = [8, 128], strides = [1, 1]} : vector<8x256xf32> to vector<8x128xf32>
    %40 = math.tanh %39 : vector<8x128xf32>
    %41 = arith.subf %40, %24 : vector<8x128xf32>
    %42 = arith.mulf %38, %41 : vector<8x128xf32>
    %43 = arith.addf %24, %42 : vector<8x128xf32>
    %c0_20 = arith.constant 0 : index
    %c0_21 = arith.constant 0 : index
    %44 = vector.load %arg1[%c0_20, %c0_21] : memref<8x128xf32, #tpu.memory_space<vmem>>, vector<8x128xf32>
    %45 = arith.addf %43, %44 : vector<8x128xf32>
    %c0_22 = arith.constant 0 : index
    %c0_23 = arith.constant 0 : index
    %46 = vector.load %arg6[%c0_22, %c0_23] : memref<8x128xf32, #tpu.memory_space<vmem>>, vector<8x128xf32>
    tpu.vector_store %arg6[%c0_22, %c0_23], %45 {strides = array<i32>} : memref<8x128xf32, #tpu.memory_space<vmem>>, vector<8x128xf32>,
    return
  }
}

</mosaic_0001>

<bundles_post_ra>
// kernel: tpu_custom_call.1
= control target key start
LH: loop header
LB: loop body
LE: loop exit
PB: predicated region body
PF: predicated region fallthrough
CT: control target
= control target key end

     0   :  { %11 = vsyncpa [#allocation3], 0  ;;  %s862_s0 = inlined_call_operand.hbm [shape: bf16[8,128], index: 0, kind: input, shape index: {}]   ;;  %s863_s1 = inlined_call_operand.hbm [shape: f32[8,128], index: 1, kind: input, shape index: {}]   ;;  %s864_s2 = inlined_call_operand.hbm [shape: bf16[128,128], index: 2, kind: input, shape index: {}]   ;;  %s865_s3 = inlined_call_operand.vmem [shape: f32[1,128], index: 3, kind: input, shape index: {}]   ;;  %s866_s4 = inlined_call_operand.hbm [shape: bf16[2,128,256], index: 4, kind: input, shape index: {}]   ;;  %s867_s5 = inlined_call_operand.vmem [shape: f32[2,1,256], index: 5, kind: input, shape index: {}]   ;;  %s868_s6 = inlined_call_operand.hbm [shape: f32[8,128], index: 6, kind: output, shape index: {}]  }
   0x1   :  { %12 = vsyncpa [#allocation6], 0 }
   0x2   :  { %13 = vsyncpa [#allocation9], 0 }
   0x3   :  { %14 = vsyncpa [#allocation4], 0  ;;  %s791_s21 = smov [#allocation5]   ;;  %s792_s23 = smov [#allocation2]  }
   0x4   :  { %s31_s22 = sshll.u32 %s791_s21, 4  ;;  %s21_s24 = sshll.u32 %s792_s23, 4  ;;  %s32_s22 = int_to_ptr.vmem [resolvable:$true] %s31_s22  ;;  %s22_s24 = int_to_ptr.vmem [resolvable:$true] %s21_s24 }
   0x5   :  { %s691_s25 = scalar_lea.vmem %s32_s22, 128  ;;  %p696_p1 = scmp.lt.s32.totalorder %s32_s22, %s32_s22 }
   0x6   :  { %p692_p0 = scmp.ne.s32.totalorder %s32_s22, %s691_s25  ;;  %p697_p2 = scmp.lt.s32.totalorder %s691_s25, %s691_s25 }
   0x8   :  { %p698_p3 = por %p697_p2, %p696_p1 }
   0xa   :  { %p699_p4 = pnand %p698_p3, %p692_p0 }
   0xc   :  { %702 = shalt.err (!%p699_p4)
}
   0xd   :  { %34 = dma.hbm_to_vmem [thread:$0]  %s863_s1, 128, %s32_s22, [#allocation6]  }
   0xe   :  { %s711_s28 = scalar_lea.vmem %s22_s24, 64  ;;  %p716_p6 = scmp.lt.s32.totalorder %s22_s24, %s22_s24 }
   0xf   :  { %p712_p5 = scmp.ne.s32.totalorder %s22_s24, %s711_s28  ;;  %p717_p7 = scmp.lt.s32.totalorder %s711_s28, %s711_s28 }
  0x11   :  { %p718_p8 = por %p717_p7, %p716_p6 }
  0x13   :  { %p719_p9 = pnand %p718_p8, %p712_p5 }
  0x15   :  { %722 = shalt.err (!%p719_p9)
}
  0x16   :  { %24 = dma.hbm_to_vmem [thread:$0]  %s862_s0, 64, %s22_s24, [#allocation3]  }
  0x17   :  { %s793_s7 = smov [#allocation7]  }
  0x18   :  { %s40_s8 = sshll.u32 %s793_s7, 4  ;;  %s41_s8 = int_to_ptr.vmem [resolvable:$true] %s40_s8 }
  0x19   :  { %s731_s9 = scalar_lea.vmem %s41_s8, 1024  ;;  %p736_p11 = scmp.lt.s32.totalorder %s41_s8, %s41_s8 }
  0x1a   :  { %p732_p10 = scmp.ne.s32.totalorder %s41_s8, %s731_s9  ;;  %p737_p12 = scmp.lt.s32.totalorder %s731_s9, %s731_s9 }
  0x1c   :  { %p738_p13 = por %p737_p12, %p736_p11 }
  0x1e   :  { %p739_p0 = pnand %p738_p13, %p732_p10 }
  0x20   :  { %742 = shalt.err (!%p739_p0)
}
  0x21   :  { %s794_s1 = smov 64   ;;  %s795_s10 = smov 4  }
  0x22   :  { %46 = dma.hbm_to_vmem [thread:$0]  %s864_s2, 1024, %s41_s8, [#allocation6], %s794_s1, %s794_s1, %s795_s10  }
  0x23   :  { %s796_s13 = smov [#allocation8]  }
  0x24   :  { %s54_s14 = sshll.u32 %s796_s13, 4  ;;  %s55_s14 = int_to_ptr.vmem [resolvable:$true] %s54_s14 }
  0x25   :  { %s751_s0 = scalar_lea.vmem %s55_s14, 4096  ;;  %p756_p2 = scmp.lt.s32.totalorder %s55_s14, %s55_s14 }
  0x26   :  { %p752_p1 = scmp.ne.s32.totalorder %s55_s14, %s751_s0  ;;  %p757_p3 = scmp.lt.s32.totalorder %s751_s0, %s751_s0 }
  0x28   :  { %p758_p4 = por %p757_p3, %p756_p2 }
  0x2a   :  { %p759_p5 = pnand %p758_p4, %p752_p1 }
  0x2c   :  { %762 = shalt.err (!%p759_p5)
}
  0x2d   :  { %s797_s15 = smov 128   ;;  %s798_s16 = smov 8  }
  0x2e   :  { %60 = dma.hbm_to_vmem [thread:$0]  %s866_s4, 4096, %s55_s14, [#allocation9], %s797_s15, %s797_s15, %s798_s16  }
  0x2f   :  { %783 = dma.done.wait [#allocation3], 64  }
  0x30   :  { %784 = vsyncadd [#allocation3], 4294967232 }
  0x31   :  { %785 = dma.done.wait [#allocation6], 1152  }
  0x32   :  { %786 = vsyncadd [#allocation6], 4294966144 }
  0x33   :  { %787 = dma.done.wait [#allocation9], 4096  }
  0x34   :  { %788 = vsyncadd [#allocation9], 4294963200  ;;  %v799_v0 = vmov 0.0   ;;  %vm800_vm0 = vmmov 0   ;;  %v615_v1 = vld [vmem:[#allocation7 + $0x38] sm:$0xff]   ;;  %v616_v2 = vld [vmem:[#allocation7 + $0x30] sm:$0xff]   ;;  %v207_v50 = vlaneseq }
  0x35   :  { %583 = vmatprep.subr.bf16.mxu0 %v799_v0  ;;  %599 = vmatprep.mubr.msk.bf16.mxu0 %vm800_vm0, %v799_v0  ;;  %v617_v3 = vld [vmem:[#allocation7 + $0x28] sm:$0xff]   ;;  %v623_v4 = vld [vmem:[#allocation8 + $0x74] ss:$8 sps:$4 sm:$0xff]   ;;  %v625_v5 = vld [vmem:[#allocation8 + $0x70] ss:$8 sps:$4 sm:$0xff]   ;;  %v801_v26 = vmov 0  }
  0x36   :  { %584 = vmatpush3.bf16.msra.mxu0 %v615_v1  ;;  %v618_v6 = vld [vmem:[#allocation7 + $0x20] sm:$0xff]   ;;  %297 = vmatprep.subr.bf16.mxu1 %v623_v4  ;;  %v629_v9 = vld [vmem:[#allocation8 + $0x54] ss:$8 sps:$4 sm:$0xff]   ;;  %v631_v11 = vld [vmem:[#allocation8 + $0x50] ss:$8 sps:$4 sm:$0xff]   ;;  %v208_v51 = vshrl.u32 %v207_v50, 7 }
  0x37   :  { %585 = vmatprep.subr.bf16.mxu0 %v799_v0  ;;  %v626_v7 = vld [vmem:[#allocation8 + $0x64] ss:$8 sps:$4 sm:$0xff]   ;;  %298 = vmatpush1.bf16.msra.mxu1 %v625_v5  ;;  %v628_v8 = vld [vmem:[#allocation8 + $0x60] ss:$8 sps:$4 sm:$0xff]   ;;  %v619_v10 = vld [vmem:[#allocation7 + $0x18] sm:$0xff]  }
  0x38   :  { %299 = vmatprep.subr.bf16.mxu1 %v626_v7  ;;  %v620_v12 = vld [vmem:[#allocation7 + $0x10] sm:$0xff]   ;;  %v632_v13 = vld [vmem:[#allocation8 + $0x44] ss:$8 sps:$4 sm:$0xff]   ;;  %v634_v14 = vld [vmem:[#allocation8 + $0x40] ss:$8 sps:$4 sm:$0xff]   ;;  %329 = vmatprep.mubr.bf16.mxu1 %v801_v26  ;;  %v209_v52 = vsub.s32 0, %v208_v51 }
  0x39   :  { %v635_v15 = vld [vmem:[#allocation8 + $0x34] ss:$8 sps:$4 sm:$0xff]   ;;  %v621_v16 = vld [vmem:[#allocation7 + $0x8] sm:$0xff]   ;;  %v637_v17 = vld [vmem:[#allocation8 + $0x30] ss:$8 sps:$4 sm:$0xff]   ;;  %v213_v60 = vsub.s32 1, %v208_v51 }
  0x3a   :  { %586 = vmatpush3.bf16.msra.mxu0 %v616_v2  ;;  %v638_v18 = vld [vmem:[#allocation8 + $0x24] ss:$8 sps:$4 sm:$0xff]   ;;  %v640_v20 = vld [vmem:[#allocation8 + $0x20] ss:$8 sps:$4 sm:$0xff]   ;;  %v641_v21 = vld [vmem:[#allocation8 + $0x14] ss:$8 sps:$4 sm:$0xff]  }
  0x3b   :  { %587 = vmatprep.subr.bf16.mxu0 %v799_v0  ;;  %300 = vmatpush1.bf16.msra.mxu1 %v628_v8  ;;  %v622_v19 = vld [vmem:[#allocation7] sm:$0xff]   ;;  %v76_v22 = vld [vmem:[#allocation2] sm:$0xf]  ;;  %v643_v23 = vld [vmem:[#allocation8 + $0x10] ss:$8 sps:$4 sm:$0xff]  }
  0x3c   :  { %301 = vmatprep.subr.bf16.mxu1 %v629_v9  ;;  %v644_v24 = vld [vmem:[#allocation8 + $0x4] ss:$8 sps:$4 sm:$0xff]   ;;  %v646_v25 = vld [vmem:[#allocation8] ss:$8 sps:$4 sm:$0xff]   ;;  %v530_v27 = vld [vmem:[%s865_s3] ss:$0 sm:$0xff] }
  0x3d   :  { %v649_v34 = vld [vmem:[#allocation8 + $0xf4] ss:$8 sps:$4 sm:$0xff]   ;;  %v647_v35 = vld [vmem:[#allocation8 + $0xf0] ss:$8 sps:$4 sm:$0xff]   ;;  %v652_v36 = vld [vmem:[#allocation8 + $0xe4] ss:$8 sps:$4 sm:$0xff]  }
  0x3e   :  { %588 = vmatpush3.bf16.msra.mxu0 %v617_v3  ;;  %v650_v37 = vld [vmem:[#allocation8 + $0xe0] ss:$8 sps:$4 sm:$0xff]   ;;  %v655_v38 = vld [vmem:[#allocation8 + $0xd4] ss:$8 sps:$4 sm:$0xff]   ;;  %v653_v39 = vld [vmem:[#allocation8 + $0xd0] ss:$8 sps:$4 sm:$0xff]  }
  0x3f   :  { %589 = vmatprep.subr.bf16.mxu0 %v799_v0  ;;  %302 = vmatpush1.bf16.msra.mxu1 %v631_v11  ;;  %v658_v40 = vld [vmem:[#allocation8 + $0xc4] ss:$8 sps:$4 sm:$0xff]   ;;  %v656_v41 = vld [vmem:[#allocation8 + $0xc0] ss:$8 sps:$4 sm:$0xff]   ;;  %v661_v42 = vld [vmem:[#allocation8 + $0xb4] ss:$8 sps:$4 sm:$0xff]  }
  0x40   :  { %303 = vmatprep.subr.bf16.mxu1 %v632_v13  ;;  %v659_v43 = vld [vmem:[#allocation8 + $0xb0] ss:$8 sps:$4 sm:$0xff]   ;;  %v664_v44 = vld [vmem:[#allocation8 + $0xa4] ss:$8 sps:$4 sm:$0xff]   ;;  %v662_v45 = vld [vmem:[#allocation8 + $0xa0] ss:$8 sps:$4 sm:$0xff]  }
  0x41   :  { %v667_v46 = vld [vmem:[#allocation8 + $0x94] ss:$8 sps:$4 sm:$0xff]   ;;  %v665_v47 = vld [vmem:[#allocation8 + $0x90] ss:$8 sps:$4 sm:$0xff]   ;;  %v670_v48 = vld [vmem:[#allocation8 + $0x84] ss:$8 sps:$4 sm:$0xff]  }
  0x42   :  { %590 = vmatpush3.bf16.msra.mxu0 %v618_v6  ;;  %v668_v49 = vld [vmem:[#allocation8 + $0x80] ss:$8 sps:$4 sm:$0xff]   ;;  %v205_v53 = vld [vmem:[%s867_s5] sm:$0x3]  ;;  %v556_v8 = vld [vmem:[%s867_s5 + $0x2] sm:$0x3] }
  0x43   :  { %591 = vmatprep.subr.bf16.mxu0 %v799_v0  ;;  %304 = vmatpush1.bf16.msra.mxu1 %v634_v14  ;;  %v210_v54 = vrot.slane %v205_v53, %v209_v52  ;;  %v214_v62 = vrot.slane %v205_v53, %v213_v60  ;;  %v372_v9 = vrot.slane %v556_v8, %v209_v52  ;;  %s802_s5 = smov [#allocation10]  }
  0x44   :  { %305 = vmatprep.subr.bf16.mxu1 %v635_v15  ;;  %s519_s22 = sshll.u32 %s802_s5, 4  ;;  %s520_s22 = int_to_ptr.vmem [resolvable:$true] %s519_s22 }
  0x45   :  { %s763_s23 = scalar_lea.vmem %s520_s22, 128  ;;  %p768_p7 = scmp.lt.s32.totalorder %s520_s22, %s520_s22 }
  0x46   :  { %592 = vmatpush3.bf16.msra.mxu0 %v619_v10  ;;  %p764_p6 = scmp.ne.s32.totalorder %s520_s22, %s763_s23  ;;  %p769_p8 = scmp.lt.s32.totalorder %s763_s23, %s763_s23 }
  0x47   :  { %593 = vmatprep.subr.bf16.mxu0 %v799_v0  ;;  %306 = vmatpush1.bf16.msra.mxu1 %v637_v17 }
  0x48   :  { %307 = vmatprep.subr.bf16.mxu1 %v638_v18  ;;  %p770_p9 = por %p769_p8, %p768_p7 }
  0x4a   :  { %594 = vmatpush3.bf16.msra.mxu0 %v620_v12  ;;  %p771_p10 = pnand %p770_p9, %p764_p6 }
  0x4b   :  { %595 = vmatprep.subr.bf16.mxu0 %v799_v0  ;;  %308 = vmatpush1.bf16.msra.mxu1 %v640_v20 }
  0x4c   :  { %309 = vmatprep.subr.bf16.mxu1 %v641_v21 }
  0x4e   :  { %596 = vmatpush3.bf16.msra.mxu0 %v621_v16  ;;  %v376_v16 = vrot.slane %v556_v8, %v213_v60 }
  0x4f   :  { %597 = vmatprep.subr.bf16.mxu0 %v799_v0  ;;  %310 = vmatpush1.bf16.msra.mxu1 %v643_v23 }
  0x50   :  { %311 = vmatprep.subr.bf16.mxu1 %v644_v24  ;;  %v510_v24 = vld [vmem:[#allocation5] sm:$0xff] }
  0x52   :  { %598 = vmatpush3.bf16.msra.mxu0 %v622_v19 }
  0x53   :  { %312 = vmatpush1.bf16.msra.mxu1 %v646_v25  ;;  %459 = vmatprep.subr.bf16.mxu0 %v649_v34 }
  0x55   :  { %600 = vmatmul.mubr.bf16.vlgmr.msra.gmra.mxu0 %v76_v22 }
  0x56   :  { %491 = vmatprep.mubr.bf16.mxu0 %v801_v26  ;;  %460 = vmatpush1.bf16.msra.mxu0 %v647_v35 }
  0x57   :  { %461 = vmatprep.subr.bf16.mxu0 %v652_v36 }
  0x5a   :  { %462 = vmatpush1.bf16.msra.mxu0 %v650_v37 }
  0x5b   :  { %463 = vmatprep.subr.bf16.mxu0 %v655_v38 }
  0x5e   :  { %464 = vmatpush1.bf16.msra.mxu0 %v653_v39 }
  0x5f   :  { %465 = vmatprep.subr.bf16.mxu0 %v658_v40 }
  0x62   :  { %466 = vmatpush1.bf16.msra.mxu0 %v656_v41 }
  0x63   :  { %467 = vmatprep.subr.bf16.mxu0 %v661_v42 }
  0x66   :  { %468 = vmatpush1.bf16.msra.mxu0 %v659_v43 }
  0x67   :  { %469 = vmatprep.subr.bf16.mxu0 %v664_v44 }
  0x6a   :  { %470 = vmatpush1.bf16.msra.mxu0 %v662_v45 }
  0x6b   :  { %471 = vmatprep.subr.bf16.mxu0 %v667_v46 }
  0x6e   :  { %472 = vmatpush1.bf16.msra.mxu0 %v665_v47 }
  0x6f   :  { %473 = vmatprep.subr.bf16.mxu0 %v670_v48 }
  0x72   :  { %474 = vmatpush1.bf16.msra.mxu0 %v668_v49 }
 0x115   :  { %v182_v28 = vpop.f32.mrf.mxu0 }
 0x116   :  { %v183_v29 = vadd.f32 %v530_v27, %v182_v28 }
 0x117   :  { %v601_v30 = vpop.f32.mrf.mxu0 }
 0x118   :  { %v188_v31 = vpack.c.bf16 %v183_v29, %v183_v29 }
 0x119   :  { %v185_v32 = vpop.f32.mrf.mxu0 }
 0x11a   :  { %330 = vmatmul.mubr.bf16.vlgmr.msra.gmra.mxu1 %v188_v31 }
 0x11b   :  { %v602_v33 = vpop.f32.mrf.mxu0 }
 0x1da   :  { %v331_v55 = vpop.f32.mrf.mxu1 }
 0x1db   :  { %v332_v56 = vadd.f32 %v331_v55, %v210_v54 }
 0x1dc   :  { %v333_v57 = vpop.f32.mrf.mxu1 }
 0x1dd   :  { %v555_v58 = vmul.f32 -1.442695, %v332_v56  ;;  %v334_v63 = vadd.f32 %v333_v57, %v214_v62 }
 0x1de   :  { %v335_v59 = vpop.f32.mrf.mxu1 }
 0x1df   :  { %671 = vpow2.f32 %v555_v58 }
 0x1e0   :  { %v336_v61 = vpop.f32.mrf.mxu1  ;;  %673 = vtanh.f32 %v334_v63 }
 0x1ec   :  { %v672_v0 = vpop.eup %671 }
 0x1ed   :  { %v341_v1 = vadd.f32 1.0, %v672_v0  ;;  %v674_v2 = vpop.eup %673 }
 0x1ee   :  { %v345_v3 = vsub.f32 %v674_v2, %v183_v29 }
 0x1ef   :  { %675 = vrcp.f32 %v341_v1 }
 0x1fc   :  { %v676_v4 = vpop.eup %675 }
 0x1fd   :  { %v346_v5 = vmul.f32 %v676_v4, %v345_v3 }
 0x1ff   :  { %v347_v6 = vadd.f32 %v346_v5, %v183_v29 }
 0x201   :  { %v348_v7 = vpack.c.bf16 %v347_v6, %v347_v6 }
 0x203   :  { %492 = vmatmul.mubr.bf16.vlgmr.msra.gmra.mxu0 %v348_v7 }
 0x2c3   :  { %v493_v10 = vpop.f32.mrf.mxu0 }
 0x2c4   :  { %v494_v11 = vadd.f32 %v493_v10, %v372_v9 }
 0x2c5   :  { %v495_v12 = vpop.f32.mrf.mxu0 }
 0x2c6   :  { %v573_v13 = vmul.f32 -1.442695, %v494_v11  ;;  %v496_v17 = vadd.f32 %v495_v12, %v376_v16 }
 0x2c7   :  { %v497_v14 = vpop.f32.mrf.mxu0 }
 0x2c8   :  { %677 = vpow2.f32 %v573_v13 }
 0x2c9   :  { %v498_v15 = vpop.f32.mrf.mxu0  ;;  %679 = vtanh.f32 %v496_v17 }
 0x2d5   :  { %v678_v18 = vpop.eup %677 }
 0x2d6   :  { %v503_v19 = vadd.f32 1.0, %v678_v18  ;;  %v680_v20 = vpop.eup %679 }
 0x2d7   :  { %v507_v21 = vsub.f32 %v680_v20, %v347_v6 }
 0x2d8   :  { %681 = vrcp.f32 %v503_v19 }
 0x2e5   :  { %v682_v22 = vpop.eup %681 }
 0x2e6   :  { %v508_v23 = vmul.f32 %v682_v22, %v507_v21 }
 0x2e8   :  { %v509_v25 = vadd.f32 %v508_v23, %v347_v6 }
 0x2ea   :  { %v511_v26 = vadd.f32 %v510_v24, %v509_v25 }
 0x2ec   :  { %512 = vst [vmem:[#allocation10] sm:$0xff] %v511_v26 }
 0x2ed   :  { %774 = shalt.err (!%p771_p10)
}
 0x2ee   :  { %522 = dma.vmem_to_hbm [thread:$0]  %s520_s22, 128, %s868_s6, [#allocation4]  }
 0x2ef   :  { %789 = dma.done.wait [#allocation4], 128  }
 0x2f0   :  { %790 = vsyncadd [#allocation4], 4294967168 }
 0x2f1   :  { %526 = vsyncpa [#allocation3], 1 }
 0x2f2   :  { %527 = vsyncpa [#allocation6], 1 }
 0x2f3   :  { %528 = vsyncpa [#allocation9], 1 }
 0x2f4   :  { %529 = vsyncpa [#allocation4], 1 }

</bundles_post_ra>
